<compile_context>
chip_gen: v7x
topology: tpu7x:2x2x1
jax: 0.10.0
libtpu: 0.0.40
codegen_flags: <defaults>
</compile_context>

<pallas_src>
import jax
import jax.numpy as jnp
from jax.experimental import pallas as pl
from jax.experimental.pallas import tpu as pltpu


def lstm_kernel(tok_ref, proj_ref, whh_ref, out_ref, hn_ref, cn_ref):
    """Single-layer LSTM recurrence with in-kernel embedding-projection gather.

    tok_ref : SMEM (T*B,) int32  time-major flattened token ids (scalar prefetch)
    proj_ref: VMEM (V, 4H) f32   emb @ W_ih + (b_ih + b_hh), gate order i|f|o|g
    whh_ref : VMEM (H, 4H) f32   recurrent weights, gate order i|f|o|g
    out_ref : VMEM (B, T*H) f32  lane-dense hidden-state slab (batch-major)
    hn_ref  : VMEM (B, H)  f32   final hidden state
    cn_ref  : VMEM (B, H)  f32   final cell state
    """
    B, H = hn_ref.shape
    T = out_ref.shape[1] // H
    H3 = 3 * H

    # Loop-invariant recurrent weights: loaded once, (32, 128) = 4 vregs.
    whh = whh_ref[...]

    h = jnp.zeros((B, H), jnp.float32)
    c = jnp.zeros((B, H), jnp.float32)

    for t in range(T):  # T is static -> fully unrolled, all indices static
        # In-kernel gather of the precomputed input projections for step t.
        # Independent of h, so these loads issue ahead of the recurrence.
        zx = jnp.concatenate(
            [proj_ref[pl.ds(tok_ref[t * B + b], 1), :] for b in range(B)],
            axis=0)                                                # (B, 4H)

        # One fused recurrent matmul per step: (B, H) @ (H, 4H) -> (B, 4H).
        z = zx + jnp.dot(h, whh, preferred_element_type=jnp.float32)

        # Full-vreg transcendentals; gate order i|f|o|g means sigmoid covers
        # the first 3H lanes and tanh the last H.
        s = jax.nn.sigmoid(z)
        tz = jnp.tanh(z)
        i = s[:, 0:H]
        f = s[:, H:2 * H]
        o = s[:, 2 * H:H3]
        g = tz[:, H3:4 * H]

        c = f * c + i * g
        h = o * jnp.tanh(c)

        # Static-lane-offset store of h_t; off the serial dependence chain.
        out_ref[:, t * H:(t + 1) * H] = h

    hn_ref[...] = h
    cn_ref[...] = c


def _reorder_gates(w, H):
    """PyTorch LSTM gate order i|f|g|o  ->  kernel order i|f|o|g (last axis)."""
    return jnp.concatenate(
        [w[..., :2 * H], w[..., 3 * H:4 * H], w[..., 2 * H:3 * H]], axis=-1)


def encoder_forward(tokens, params):
    """Mirrors Encoder.forward: embs = dropout(embedding(x)); out, state = lstm(embs)."""
    emb = params["embedding"]          # (V, E); padding_idx row already zeroed
    w_ih = params["w_ih"]              # (E, 4H), PyTorch gate order i|f|g|o
    w_hh = params["w_hh"]              # (H, 4H)
    bias = params["bias"]              # (1, 4H) = b_ih + b_hh

    H = w_hh.shape[0]
    B, T = tokens.shape

    # dropout p=0 (default) / eval mode -> identity.
    # TODO(synk): stochastic dropout (p>0, training) not implemented in-kernel.

    # Fold embedding + input projection + both biases into one lane-dense
    # (V, 4H) table, reordered to the kernel's i|f|o|g gate layout.
    proj = _reorder_gates(emb @ w_ih + bias, H).astype(jnp.float32)   # (V, 4H)
    whh = _reorder_gates(w_hh, H).astype(jnp.float32)                 # (H, 4H)

    # Time-major flattened tokens -> SMEM via scalar prefetch.
    tokens_flat = tokens.T.reshape(-1).astype(jnp.int32)              # (T*B,)

    vmem = pl.BlockSpec(memory_space=pltpu.MemorySpace.VMEM)
    grid_spec = pltpu.PrefetchScalarGridSpec(
        num_scalar_prefetch=1,      # tokens -> SMEM
        grid=(),                    # single invocation; whole problem VMEM-resident
        in_specs=[vmem, vmem],
        out_specs=(vmem, vmem, vmem),
    )

    out_flat, h_n, c_n = pl.pallas_call(
        lstm_kernel,
        grid_spec=grid_spec,
        out_shape=(
            jax.ShapeDtypeStruct((B, T * H), jnp.float32),
            jax.ShapeDtypeStruct((B, H), jnp.float32),
            jax.ShapeDtypeStruct((B, H), jnp.float32),
        ),
    )(tokens_flat, proj, whh)

    outputs = out_flat.reshape(B, T, H)                # batch_first=True, no transpose
    state = (h_n[None, :, :], c_n[None, :, :])         # (num_layers=1, B, H) each
    return outputs, state


def ref_forward(tokens, params):
    """Pure-JAX reference (mirrors torch semantics) for correctness check."""
    embs = params["embedding"][tokens]                 # (B, T, E)
    B, T, _ = embs.shape
    H = params["w_hh"].shape[0]
    h = jnp.zeros((B, H), jnp.float32)
    c = jnp.zeros((B, H), jnp.float32)
    outs = []
    for t in range(T):
        z = embs[:, t] @ params["w_ih"] + h @ params["w_hh"] + params["bias"]
        i = jax.nn.sigmoid(z[:, :H])
        f = jax.nn.sigmoid(z[:, H:2 * H])
        g = jnp.tanh(z[:, 2 * H:3 * H])
        o = jax.nn.sigmoid(z[:, 3 * H:])
        c = f * c + i * g
        h = o * jnp.tanh(c)
        outs.append(h)
    return jnp.stack(outs, axis=1), (h[None], c[None])


def init_params(key, input_dim, embed_dim, hidden_dim, padding_idx=None):
    k_emb, k_wih, k_whh, k_bih, k_bhh = jax.random.split(key, 5)
    emb = jax.random.normal(k_emb, (input_dim, embed_dim), jnp.float32)
    if padding_idx is not None:
        emb = emb.at[padding_idx].set(0.0)  # nn.Embedding zeros the padding row
    bound = 1.0 / jnp.sqrt(hidden_dim)      # PyTorch LSTM init: U(-1/sqrt(H), 1/sqrt(H))
    w_ih = jax.random.uniform(k_wih, (embed_dim, 4 * hidden_dim), jnp.float32, -bound, bound)
    w_hh = jax.random.uniform(k_whh, (hidden_dim, 4 * hidden_dim), jnp.float32, -bound, bound)
    b_ih = jax.random.uniform(k_bih, (4 * hidden_dim,), jnp.float32, -bound, bound)
    b_hh = jax.random.uniform(k_bhh, (4 * hidden_dim,), jnp.float32, -bound, bound)
    bias = (b_ih + b_hh).reshape(1, 4 * hidden_dim)
    return {"embedding": emb, "w_ih": w_ih, "w_hh": w_hh, "bias": bias}


if __name__ == "__main__":
    # Small shapes consistent with the module's forward.
    INPUT_DIM = 32     # vocab size
    EMBED_DIM = 16
    HIDDEN_DIM = 32
    B, T = 2, 8
    PAD_IDX = 0

    key = jax.random.PRNGKey(0)
    k_params, k_tok = jax.random.split(key)
    params = init_params(k_params, INPUT_DIM, EMBED_DIM, HIDDEN_DIM, padding_idx=PAD_IDX)
    tokens = jax.random.randint(k_tok, (B, T), 0, INPUT_DIM, dtype=jnp.int32)

    outputs, (h_n, c_n) = jax.jit(encoder_forward)(tokens, params)
    jax.block_until_ready((outputs, h_n, c_n))

    ref_out, (ref_h, ref_c) = ref_forward(tokens, params)
    assert outputs.shape == (B, T, HIDDEN_DIM)
    assert h_n.shape == (1, B, HIDDEN_DIM) and c_n.shape == (1, B, HIDDEN_DIM)
    assert jnp.allclose(outputs, ref_out, atol=1e-5, rtol=1e-5)
    assert jnp.allclose(h_n, ref_h, atol=1e-5, rtol=1e-5)
    assert jnp.allclose(c_n, ref_c, atol=1e-5, rtol=1e-5)

    print("KERNEL_OK")
</pallas_src>

<mosaic_0001>
module attributes {stable_mosaic.version = 11 : i64} {
  func.func @lstm_kernel(%arg0: memref<16xi32, #tpu.memory_space<smem>>, %arg1: memref<32x128xf32, #tpu.memory_space<vmem>>, %arg2: memref<32x128xf32, #tpu.memory_space<vmem>>, %arg3: memref<2x256xf32, #tpu.memory_space<vmem>>, %arg4: memref<2x32xf32, #tpu.memory_space<vmem>>, %arg5: memref<2x32xf32, #tpu.memory_space<vmem>>) attributes {dimension_semantics = [], scalar_prefetch = 1 : i64, scratch_operands = 0 : i64, tpu.core_type = #tpu.core_type<tc>} {
    %c0 = arith.constant 0 : index
    %c0_0 = arith.constant 0 : index
    %0 = vector.load %arg2[%c0, %c0_0] : memref<32x128xf32, #tpu.memory_space<vmem>>, vector<32x128xf32>
    %cst = arith.constant 0.000000e+00 : f32
    %1 = vector.broadcast %cst : f32 to vector<2x32xf32>
    %cst_1 = arith.constant 0.000000e+00 : f32
    %2 = vector.broadcast %cst_1 : f32 to vector<2x32xf32>
    %c0_2 = arith.constant 0 : index
    %3 = memref.load %arg0[%c0_2] : memref<16xi32, #tpu.memory_space<smem>>
    %4 = arith.index_cast %3 : i32 to index
    %c0_3 = arith.constant 0 : index
    %5 = vector.load %arg1[%4, %c0_3] : memref<32x128xf32, #tpu.memory_space<vmem>>, vector<1x128xf32>
    %c1 = arith.constant 1 : index
    %6 = memref.load %arg0[%c1] : memref<16xi32, #tpu.memory_space<smem>>
    %7 = arith.index_cast %6 : i32 to index
    %c0_4 = arith.constant 0 : index
    %8 = vector.load %arg1[%7, %c0_4] : memref<32x128xf32, #tpu.memory_space<vmem>>, vector<1x128xf32>
    %9 = tpu.concatenate %5, %8 in 0 : vector<1x128xf32>, vector<1x128xf32> -> vector<2x128xf32>
    %cst_5 = arith.constant dense<0.000000e+00> : vector<2x128xf32>
    %10 = tpu.matmul %1, %0, %cst_5 {dimension_numbers = #tpu.dot_dimension_numbers<[1], [0], [0], [1], [0, 0, 1, 1], [], []>} : vector<2x32xf32>, vector<32x128xf32>, vector<2x128xf32> -> vector<2x128xf32>
    %11 = arith.addf %9, %10 : vector<2x128xf32>
    %12 = arith.negf %11 : vector<2x128xf32>
    %13 = math.exp %12 : vector<2x128xf32>
    %cst_6 = arith.constant 1.000000e+00 : f32
    %14 = vector.broadcast %cst_6 : f32 to vector<2x128xf32>
    %15 = arith.addf %14, %13 : vector<2x128xf32>
    %16 = arith.divf %14, %15 : vector<2x128xf32>
    %17 = math.tanh %11 : vector<2x128xf32>
    %18 = vector.extract_strided_slice %16 {offsets = [0, 0], sizes = [2, 32], strides = [1, 1]} : vector<2x128xf32> to vector<2x32xf32>
    %19 = vector.extract_strided_slice %16 {offsets = [0, 32], sizes = [2, 32], strides = [1, 1]} : vector<2x128xf32> to vector<2x32xf32>
    %20 = vector.extract_strided_slice %16 {offsets = [0, 64], sizes = [2, 32], strides = [1, 1]} : vector<2x128xf32> to vector<2x32xf32>
    %21 = vector.extract_strided_slice %17 {offsets = [0, 96], sizes = [2, 32], strides = [1, 1]} : vector<2x128xf32> to vector<2x32xf32>
    %22 = arith.mulf %19, %2 : vector<2x32xf32>
    %23 = arith.mulf %18, %21 : vector<2x32xf32>
    %24 = arith.addf %22, %23 : vector<2x32xf32>
    %25 = math.tanh %24 : vector<2x32xf32>
    %26 = arith.mulf %20, %25 : vector<2x32xf32>
    %c0_7 = arith.constant 0 : index
    %c0_8 = arith.constant 0 : index
    %27 = vector.load %arg3[%c0_7, %c0_8] : memref<2x256xf32, #tpu.memory_space<vmem>>, vector<2x32xf32>
    tpu.vector_store %arg3[%c0_7, %c0_8], %26 {strides = array<i32>} : memref<2x256xf32, #tpu.memory_space<vmem>>, vector<2x32xf32>,
    %c2 = arith.constant 2 : index
    %28 = memref.load %arg0[%c2] : memref<16xi32, #tpu.memory_space<smem>>
    %29 = arith.index_cast %28 : i32 to index
    %c0_9 = arith.constant 0 : index
    %30 = vector.load %arg1[%29, %c0_9] : memref<32x128xf32, #tpu.memory_space<vmem>>, vector<1x128xf32>
    %c3 = arith.constant 3 : index
    %31 = memref.load %arg0[%c3] : memref<16xi32, #tpu.memory_space<smem>>
    %32 = arith.index_cast %31 : i32 to index
    %c0_10 = arith.constant 0 : index
    %33 = vector.load %arg1[%32, %c0_10] : memref<32x128xf32, #tpu.memory_space<vmem>>, vector<1x128xf32>
    %34 = tpu.concatenate %30, %33 in 0 : vector<1x128xf32>, vector<1x128xf32> -> vector<2x128xf32>
    %cst_11 = arith.constant dense<0.000000e+00> : vector<2x128xf32>
    %35 = tpu.matmul %26, %0, %cst_11 {dimension_numbers = #tpu.dot_dimension_numbers<[1], [0], [0], [1], [0, 0, 1, 1], [], []>} : vector<2x32xf32>, vector<32x128xf32>, vector<2x128xf32> -> vector<2x128xf32>
    %36 = arith.addf %34, %35 : vector<2x128xf32>
    %37 = arith.negf %36 : vector<2x128xf32>
    %38 = math.exp %37 : vector<2x128xf32>
    %cst_12 = arith.constant 1.000000e+00 : f32
    %39 = vector.broadcast %cst_12 : f32 to vector<2x128xf32>
    %40 = arith.addf %39, %38 : vector<2x128xf32>
    %41 = arith.divf %39, %40 : vector<2x128xf32>
    %42 = math.tanh %36 : vector<2x128xf32>
    %43 = vector.extract_strided_slice %41 {offsets = [0, 0], sizes = [2, 32], strides = [1, 1]} : vector<2x128xf32> to vector<2x32xf32>
    %44 = vector.extract_strided_slice %41 {offsets = [0, 32], sizes = [2, 32], strides = [1, 1]} : vector<2x128xf32> to vector<2x32xf32>
    %45 = vector.extract_strided_slice %41 {offsets = [0, 64], sizes = [2, 32], strides = [1, 1]} : vector<2x128xf32> to vector<2x32xf32>
    %46 = vector.extract_strided_slice %42 {offsets = [0, 96], sizes = [2, 32], strides = [1, 1]} : vector<2x128xf32> to vector<2x32xf32>
    %47 = arith.mulf %44, %24 : vector<2x32xf32>
    %48 = arith.mulf %43, %46 : vector<2x32xf32>
    %49 = arith.addf %47, %48 : vector<2x32xf32>
    %50 = math.tanh %49 : vector<2x32xf32>
    %51 = arith.mulf %45, %50 : vector<2x32xf32>
    %c0_13 = arith.constant 0 : index
    %c32 = arith.constant 32 : index
    %52 = vector.load %arg3[%c0_13, %c32] : memref<2x256xf32, #tpu.memory_space<vmem>>, vector<2x32xf32>
    tpu.vector_store %arg3[%c0_13, %c32], %51 {strides = array<i32>} : memref<2x256xf32, #tpu.memory_space<vmem>>, vector<2x32xf32>,
    %c4 = arith.constant 4 : index
    %53 = memref.load %arg0[%c4] : memref<16xi32, #tpu.memory_space<smem>>
    %54 = arith.index_cast %53 : i32 to index
    %c0_14 = arith.constant 0 : index
    %55 = vector.load %arg1[%54, %c0_14] : memref<32x128xf32, #tpu.memory_space<vmem>>, vector<1x128xf32>
    %c5 = arith.constant 5 : index
    %56 = memref.load %arg0[%c5] : memref<16xi32, #tpu.memory_space<smem>>
    %57 = arith.index_cast %56 : i32 to index
    %c0_15 = arith.constant 0 : index
    %58 = vector.load %arg1[%57, %c0_15] : memref<32x128xf32, #tpu.memory_space<vmem>>, vector<1x128xf32>
    %59 = tpu.concatenate %55, %58 in 0 : vector<1x128xf32>, vector<1x128xf32> -> vector<2x128xf32>
    %cst_16 = arith.constant dense<0.000000e+00> : vector<2x128xf32>
    %60 = tpu.matmul %51, %0, %cst_16 {dimension_numbers = #tpu.dot_dimension_numbers<[1], [0], [0], [1], [0, 0, 1, 1], [], []>} : vector<2x32xf32>, vector<32x128xf32>, vector<2x128xf32> -> vector<2x128xf32>
    %61 = arith.addf %59, %60 : vector<2x128xf32>
    %62 = arith.negf %61 : vector<2x128xf32>
    %63 = math.exp %62 : vector<2x128xf32>
    %cst_17 = arith.constant 1.000000e+00 : f32
    %64 = vector.broadcast %cst_17 : f32 to vector<2x128xf32>
    %65 = arith.addf %64, %63 : vector<2x128xf32>
    %66 = arith.divf %64, %65 : vector<2x128xf32>
    %67 = math.tanh %61 : vector<2x128xf32>
    %68 = vector.extract_strided_slice %66 {offsets = [0, 0], sizes = [2, 32], strides = [1, 1]} : vector<2x128xf32> to vector<2x32xf32>
    %69 = vector.extract_strided_slice %66 {offsets = [0, 32], sizes = [2, 32], strides = [1, 1]} : vector<2x128xf32> to vector<2x32xf32>
    %70 = vector.extract_strided_slice %66 {offsets = [0, 64], sizes = [2, 32], strides = [1, 1]} : vector<2x128xf32> to vector<2x32xf32>
    %71 = vector.extract_strided_slice %67 {offsets = [0, 96], sizes = [2, 32], strides = [1, 1]} : vector<2x128xf32> to vector<2x32xf32>
    %72 = arith.mulf %69, %49 : vector<2x32xf32>
    %73 = arith.mulf %68, %71 : vector<2x32xf32>
    %74 = arith.addf %72, %73 : vector<2x32xf32>
    %75 = math.tanh %74 : vector<2x32xf32>
    %76 = arith.mulf %70, %75 : vector<2x32xf32>
    %c0_18 = arith.constant 0 : index
    %c64 = arith.constant 64 : index
    %77 = vector.load %arg3[%c0_18, %c64] : memref<2x256xf32, #tpu.memory_space<vmem>>, vector<2x32xf32>
    tpu.vector_store %arg3[%c0_18, %c64], %76 {strides = array<i32>} : memref<2x256xf32, #tpu.memory_space<vmem>>, vector<2x32xf32>,
    %c6 = arith.constant 6 : index
    %78 = memref.load %arg0[%c6] : memref<16xi32, #tpu.memory_space<smem>>
    %79 = arith.index_cast %78 : i32 to index
    %c0_19 = arith.constant 0 : index
    %80 = vector.load %arg1[%79, %c0_19] : memref<32x128xf32, #tpu.memory_space<vmem>>, vector<1x128xf32>
    %c7 = arith.constant 7 : index
    %81 = memref.load %arg0[%c7] : memref<16xi32, #tpu.memory_space<smem>>
    %82 = arith.index_cast %81 : i32 to index
    %c0_20 = arith.constant 0 : index
    %83 = vector.load %arg1[%82, %c0_20] : memref<32x128xf32, #tpu.memory_space<vmem>>, vector<1x128xf32>
    %84 = tpu.concatenate %80, %83 in 0 : vector<1x128xf32>, vector<1x128xf32> -> vector<2x128xf32>
    %cst_21 = arith.constant dense<0.000000e+00> : vector<2x128xf32>
    %85 = tpu.matmul %76, %0, %cst_21 {dimension_numbers = #tpu.dot_dimension_numbers<[1], [0], [0], [1], [0, 0, 1, 1], [], []>} : vector<2x32xf32>, vector<32x128xf32>, vector<2x128xf32> -> vector<2x128xf32>
    %86 = arith.addf %84, %85 : vector<2x128xf32>
    %87 = arith.negf %86 : vector<2x128xf32>
    %88 = math.exp %87 : vector<2x128xf32>
    %cst_22 = arith.constant 1.000000e+00 : f32
    %89 = vector.broadcast %cst_22 : f32 to vector<2x128xf32>
    %90 = arith.addf %89, %88 : vector<2x128xf32>
    %91 = arith.divf %89, %90 : vector<2x128xf32>
    %92 = math.tanh %86 : vector<2x128xf32>
    %93 = vector.extract_strided_slice %91 {offsets = [0, 0], sizes = [2, 32], strides = [1, 1]} : vector<2x128xf32> to vector<2x32xf32>
    %94 = vector.extract_strided_slice %91 {offsets = [0, 32], sizes = [2, 32], strides = [1, 1]} : vector<2x128xf32> to vector<2x32xf32>
    %95 = vector.extract_strided_slice %91 {offsets = [0, 64], sizes = [2, 32], strides = [1, 1]} : vector<2x128xf32> to vector<2x32xf32>
    %96 = vector.extract_strided_slice %92 {offsets = [0, 96], sizes = [2, 32], strides = [1, 1]} : vector<2x128xf32> to vector<2x32xf32>
    %97 = arith.mulf %94, %74 : vector<2x32xf32>
    %98 = arith.mulf %93, %96 : vector<2x32xf32>
    %99 = arith.addf %97, %98 : vector<2x32xf32>
    %100 = math.tanh %99 : vector<2x32xf32>
    %101 = arith.mulf %95, %100 : vector<2x32xf32>
    %c0_23 = arith.constant 0 : index
    %c96 = arith.constant 96 : index
    %102 = vector.load %arg3[%c0_23, %c96] : memref<2x256xf32, #tpu.memory_space<vmem>>, vector<2x32xf32>
    tpu.vector_store %arg3[%c0_23, %c96], %101 {strides = array<i32>} : memref<2x256xf32, #tpu.memory_space<vmem>>, vector<2x32xf32>,
    %c8 = arith.constant 8 : index
    %103 = memref.load %arg0[%c8] : memref<16xi32, #tpu.memory_space<smem>>
    %104 = arith.index_cast %103 : i32 to index
    %c0_24 = arith.constant 0 : index
    %105 = vector.load %arg1[%104, %c0_24] : memref<32x128xf32, #tpu.memory_space<vmem>>, vector<1x128xf32>
    %c9 = arith.constant 9 : index
    %106 = memref.load %arg0[%c9] : memref<16xi32, #tpu.memory_space<smem>>
    %107 = arith.index_cast %106 : i32 to index
    %c0_25 = arith.constant 0 : index
    %108 = vector.load %arg1[%107, %c0_25] : memref<32x128xf32, #tpu.memory_space<vmem>>, vector<1x128xf32>
    %109 = tpu.concatenate %105, %108 in 0 : vector<1x128xf32>, vector<1x128xf32> -> vector<2x128xf32>
    %cst_26 = arith.constant dense<0.000000e+00> : vector<2x128xf32>
    %110 = tpu.matmul %101, %0, %cst_26 {dimension_numbers = #tpu.dot_dimension_numbers<[1], [0], [0], [1], [0, 0, 1, 1], [], []>} : vector<2x32xf32>, vector<32x128xf32>, vector<2x128xf32> -> vector<2x128xf32>
    %111 = arith.addf %109, %110 : vector<2x128xf32>
    %112 = arith.negf %111 : vector<2x128xf32>
    %113 = math.exp %112 : vector<2x128xf32>
    %cst_27 = arith.constant 1.000000e+00 : f32
    %114 = vector.broadcast %cst_27 : f32 to vector<2x128xf32>
    %115 = arith.addf %114, %113 : vector<2x128xf32>
    %116 = arith.divf %114, %115 : vector<2x128xf32>
    %117 = math.tanh %111 : vector<2x128xf32>
    %118 = vector.extract_strided_slice %116 {offsets = [0, 0], sizes = [2, 32], strides = [1, 1]} : vector<2x128xf32> to vector<2x32xf32>
    %119 = vector.extract_strided_slice %116 {offsets = [0, 32], sizes = [2, 32], strides = [1, 1]} : vector<2x128xf32> to vector<2x32xf32>
    %120 = vector.extract_strided_slice %116 {offsets = [0, 64], sizes = [2, 32], strides = [1, 1]} : vector<2x128xf32> to vector<2x32xf32>
    %121 = vector.extract_strided_slice %117 {offsets = [0, 96], sizes = [2, 32], strides = [1, 1]} : vector<2x128xf32> to vector<2x32xf32>
    %122 = arith.mulf %119, %99 : vector<2x32xf32>
    %123 = arith.mulf %118, %121 : vector<2x32xf32>
    %124 = arith.addf %122, %123 : vector<2x32xf32>
    %125 = math.tanh %124 : vector<2x32xf32>
    %126 = arith.mulf %120, %125 : vector<2x32xf32>
    %c0_28 = arith.constant 0 : index
    %c128 = arith.constant 128 : index
    %127 = vector.load %arg3[%c0_28, %c128] : memref<2x256xf32, #tpu.memory_space<vmem>>, vector<2x32xf32>
    tpu.vector_store %arg3[%c0_28, %c128], %126 {strides = array<i32>} : memref<2x256xf32, #tpu.memory_space<vmem>>, vector<2x32xf32>,
    %c10 = arith.constant 10 : index
    %128 = memref.load %arg0[%c10] : memref<16xi32, #tpu.memory_space<smem>>
    %129 = arith.index_cast %128 : i32 to index
    %c0_29 = arith.constant 0 : index
    %130 = vector.load %arg1[%129, %c0_29] : memref<32x128xf32, #tpu.memory_space<vmem>>, vector<1x128xf32>
    %c11 = arith.constant 11 : index
    %131 = memref.load %arg0[%c11] : memref<16xi32, #tpu.memory_space<smem>>
    %132 = arith.index_cast %131 : i32 to index
    %c0_30 = arith.constant 0 : index
    %133 = vector.load %arg1[%132, %c0_30] : memref<32x128xf32, #tpu.memory_space<vmem>>, vector<1x128xf32>
    %134 = tpu.concatenate %130, %133 in 0 : vector<1x128xf32>, vector<1x128xf32> -> vector<2x128xf32>
    %cst_31 = arith.constant dense<0.000000e+00> : vector<2x128xf32>
    %135 = tpu.matmul %126, %0, %cst_31 {dimension_numbers = #tpu.dot_dimension_numbers<[1], [0], [0], [1], [0, 0, 1, 1], [], []>} : vector<2x32xf32>, vector<32x128xf32>, vector<2x128xf32> -> vector<2x128xf32>
    %136 = arith.addf %134, %135 : vector<2x128xf32>
    %137 = arith.negf %136 : vector<2x128xf32>
    %138 = math.exp %137 : vector<2x128xf32>
    %cst_32 = arith.constant 1.000000e+00 : f32
    %139 = vector.broadcast %cst_32 : f32 to vector<2x128xf32>
    %140 = arith.addf %139, %138 : vector<2x128xf32>
    %141 = arith.divf %139, %140 : vector<2x128xf32>
    %142 = math.tanh %136 : vector<2x128xf32>
    %143 = vector.extract_strided_slice %141 {offsets = [0, 0], sizes = [2, 32], strides = [1, 1]} : vector<2x128xf32> to vector<2x32xf32>
    %144 = vector.extract_strided_slice %141 {offsets = [0, 32], sizes = [2, 32], strides = [1, 1]} : vector<2x128xf32> to vector<2x32xf32>
    %145 = vector.extract_strided_slice %141 {offsets = [0, 64], sizes = [2, 32], strides = [1, 1]} : vector<2x128xf32> to vector<2x32xf32>
    %146 = vector.extract_strided_slice %142 {offsets = [0, 96], sizes = [2, 32], strides = [1, 1]} : vector<2x128xf32> to vector<2x32xf32>
    %147 = arith.mulf %144, %124 : vector<2x32xf32>
    %148 = arith.mulf %143, %146 : vector<2x32xf32>
    %149 = arith.addf %147, %148 : vector<2x32xf32>
    %150 = math.tanh %149 : vector<2x32xf32>
    %151 = arith.mulf %145, %150 : vector<2x32xf32>
    %c0_33 = arith.constant 0 : index
    %c160 = arith.constant 160 : index
    %152 = vector.load %arg3[%c0_33, %c160] : memref<2x256xf32, #tpu.memory_space<vmem>>, vector<2x32xf32>
    tpu.vector_store %arg3[%c0_33, %c160], %151 {strides = array<i32>} : memref<2x256xf32, #tpu.memory_space<vmem>>, vector<2x32xf32>,
    %c12 = arith.constant 12 : index
    %153 = memref.load %arg0[%c12] : memref<16xi32, #tpu.memory_space<smem>>
    %154 = arith.index_cast %153 : i32 to index
    %c0_34 = arith.constant 0 : index
    %155 = vector.load %arg1[%154, %c0_34] : memref<32x128xf32, #tpu.memory_space<vmem>>, vector<1x128xf32>
    %c13 = arith.constant 13 : index
    %156 = memref.load %arg0[%c13] : memref<16xi32, #tpu.memory_space<smem>>
    %157 = arith.index_cast %156 : i32 to index
    %c0_35 = arith.constant 0 : index
    %158 = vector.load %arg1[%157, %c0_35] : memref<32x128xf32, #tpu.memory_space<vmem>>, vector<1x128xf32>
    %159 = tpu.concatenate %155, %158 in 0 : vector<1x128xf32>, vector<1x128xf32> -> vector<2x128xf32>
    %cst_36 = arith.constant dense<0.000000e+00> : vector<2x128xf32>
    %160 = tpu.matmul %151, %0, %cst_36 {dimension_numbers = #tpu.dot_dimension_numbers<[1], [0], [0], [1], [0, 0, 1, 1], [], []>} : vector<2x32xf32>, vector<32x128xf32>, vector<2x128xf32> -> vector<2x128xf32>
    %161 = arith.addf %159, %160 : vector<2x128xf32>
    %162 = arith.negf %161 : vector<2x128xf32>
    %163 = math.exp %162 : vector<2x128xf32>
    %cst_37 = arith.constant 1.000000e+00 : f32
    %164 = vector.broadcast %cst_37 : f32 to vector<2x128xf32>
    %165 = arith.addf %164, %163 : vector<2x128xf32>
    %166 = arith.divf %164, %165 : vector<2x128xf32>
    %167 = math.tanh %161 : vector<2x128xf32>
    %168 = vector.extract_strided_slice %166 {offsets = [0, 0], sizes = [2, 32], strides = [1, 1]} : vector<2x128xf32> to vector<2x32xf32>
    %169 = vector.extract_strided_slice %166 {offsets = [0, 32], sizes = [2, 32], strides = [1, 1]} : vector<2x128xf32> to vector<2x32xf32>
    %170 = vector.extract_strided_slice %166 {offsets = [0, 64], sizes = [2, 32], strides = [1, 1]} : vector<2x128xf32> to vector<2x32xf32>
    %171 = vector.extract_strided_slice %167 {offsets = [0, 96], sizes = [2, 32], strides = [1, 1]} : vector<2x128xf32> to vector<2x32xf32>
    %172 = arith.mulf %169, %149 : vector<2x32xf32>
    %173 = arith.mulf %168, %171 : vector<2x32xf32>
    %174 = arith.addf %172, %173 : vector<2x32xf32>
    %175 = math.tanh %174 : vector<2x32xf32>
    %176 = arith.mulf %170, %175 : vector<2x32xf32>
    %c0_38 = arith.constant 0 : index
    %c192 = arith.constant 192 : index
    %177 = vector.load %arg3[%c0_38, %c192] : memref<2x256xf32, #tpu.memory_space<vmem>>, vector<2x32xf32>
    tpu.vector_store %arg3[%c0_38, %c192], %176 {strides = array<i32>} : memref<2x256xf32, #tpu.memory_space<vmem>>, vector<2x32xf32>,
    %c14 = arith.constant 14 : index
    %178 = memref.load %arg0[%c14] : memref<16xi32, #tpu.memory_space<smem>>
    %179 = arith.index_cast %178 : i32 to index
    %c0_39 = arith.constant 0 : index
    %180 = vector.load %arg1[%179, %c0_39] : memref<32x128xf32, #tpu.memory_space<vmem>>, vector<1x128xf32>
    %c15 = arith.constant 15 : index
    %181 = memref.load %arg0[%c15] : memref<16xi32, #tpu.memory_space<smem>>
    %182 = arith.index_cast %181 : i32 to index
    %c0_40 = arith.constant 0 : index
    %183 = vector.load %arg1[%182, %c0_40] : memref<32x128xf32, #tpu.memory_space<vmem>>, vector<1x128xf32>
    %184 = tpu.concatenate %180, %183 in 0 : vector<1x128xf32>, vector<1x128xf32> -> vector<2x128xf32>
    %cst_41 = arith.constant dense<0.000000e+00> : vector<2x128xf32>
    %185 = tpu.matmul %176, %0, %cst_41 {dimension_numbers = #tpu.dot_dimension_numbers<[1], [0], [0], [1], [0, 0, 1, 1], [], []>} : vector<2x32xf32>, vector<32x128xf32>, vector<2x128xf32> -> vector<2x128xf32>
    %186 = arith.addf %184, %185 : vector<2x128xf32>
    %187 = arith.negf %186 : vector<2x128xf32>
    %188 = math.exp %187 : vector<2x128xf32>
    %cst_42 = arith.constant 1.000000e+00 : f32
    %189 = vector.broadcast %cst_42 : f32 to vector<2x128xf32>
    %190 = arith.addf %189, %188 : vector<2x128xf32>
    %191 = arith.divf %189, %190 : vector<2x128xf32>
    %192 = math.tanh %186 : vector<2x128xf32>
    %193 = vector.extract_strided_slice %191 {offsets = [0, 0], sizes = [2, 32], strides = [1, 1]} : vector<2x128xf32> to vector<2x32xf32>
    %194 = vector.extract_strided_slice %191 {offsets = [0, 32], sizes = [2, 32], strides = [1, 1]} : vector<2x128xf32> to vector<2x32xf32>
    %195 = vector.extract_strided_slice %191 {offsets = [0, 64], sizes = [2, 32], strides = [1, 1]} : vector<2x128xf32> to vector<2x32xf32>
    %196 = vector.extract_strided_slice %192 {offsets = [0, 96], sizes = [2, 32], strides = [1, 1]} : vector<2x128xf32> to vector<2x32xf32>
    %197 = arith.mulf %194, %174 : vector<2x32xf32>
    %198 = arith.mulf %193, %196 : vector<2x32xf32>
    %199 = arith.addf %197, %198 : vector<2x32xf32>
    %200 = math.tanh %199 : vector<2x32xf32>
    %201 = arith.mulf %195, %200 : vector<2x32xf32>
    %c0_43 = arith.constant 0 : index
    %c224 = arith.constant 224 : index
    %202 = vector.load %arg3[%c0_43, %c224] : memref<2x256xf32, #tpu.memory_space<vmem>>, vector<2x32xf32>
    tpu.vector_store %arg3[%c0_43, %c224], %201 {strides = array<i32>} : memref<2x256xf32, #tpu.memory_space<vmem>>, vector<2x32xf32>,
    %c0_44 = arith.constant 0 : index
    %c0_45 = arith.constant 0 : index
    %203 = vector.load %arg4[%c0_44, %c0_45] : memref<2x32xf32, #tpu.memory_space<vmem>>, vector<2x32xf32>
    tpu.vector_store %arg4[%c0_44, %c0_45], %201 {strides = array<i32>} : memref<2x32xf32, #tpu.memory_space<vmem>>, vector<2x32xf32>,
    %c0_46 = arith.constant 0 : index
    %c0_47 = arith.constant 0 : index
    %204 = vector.load %arg5[%c0_46, %c0_47] : memref<2x32xf32, #tpu.memory_space<vmem>>, vector<2x32xf32>
    tpu.vector_store %arg5[%c0_46, %c0_47], %199 {strides = array<i32>} : memref<2x32xf32, #tpu.memory_space<vmem>>, vector<2x32xf32>,
    return
  }
}

</mosaic_0001>

<bundles_post_ra>
// kernel: encoder_forward.1
= control target key start
LH: loop header
LB: loop body
LE: loop exit
PB: predicated region body
PF: predicated region fallthrough
CT: control target
= control target key end

     0   :  { %s1672_s0 = inlined_call_operand.vmem [shape: s32[16], index: 0, kind: input, shape index: {}]   ;;  %s1673_s1 = inlined_call_operand.vmem [shape: f32[32,128], index: 1, kind: input, shape index: {}]   ;;  %s1674_s2 = inlined_call_operand.vmem [shape: f32[32,128], index: 2, kind: input, shape index: {}]   ;;  %s1675_s3 = inlined_call_operand.vmem [shape: f32[2,256], index: 3, kind: output, shape index: {0}]   ;;  %s1676_s4 = inlined_call_operand.hbm [shape: f32[2,32], index: 4, kind: output, shape index: {1}]   ;;  %s1677_s5 = inlined_call_operand.hbm [shape: f32[2,32], index: 5, kind: output, shape index: {2}]  }
   0x1   :  { %s11_s20 = sshll.u32 %s1672_s0, 4  ;;  %s12_s20 = int_to_ptr.vmem [resolvable:$true] %s11_s20 }
   0x2   :  { %s1317_s21 = scalar_lea.vmem %s12_s20, 16  ;;  %p1322_p1 = scmp.lt.s32.totalorder %s12_s20, %s12_s20 }
   0x3   :  { %p1318_p0 = scmp.ne.s32.totalorder %s12_s20, %s1317_s21  ;;  %p1323_p2 = scmp.lt.s32.totalorder %s1317_s21, %s1317_s21 }
   0x5   :  { %p1324_p3 = por %p1323_p2, %p1322_p1 }
   0x7   :  { %p1325_p4 = pnand %p1324_p3, %p1318_p0 }
   0x9   :  { %1328 = shalt.err (!%p1325_p4)  }
   0xa   :  { %s1379_s22 = smov [#allocation3]  }
   0xb   :  { %14 = dma.vmem_to_smem %s12_s20, 16, %s1379_s22, [#allocation2] }
   0xc   :  { %1373 = dma.done.wait [#allocation2], 16 }
   0xd   :  { %1374 = vsyncadd [#allocation2], 4294967280 }
   0xe   :  { %16 = sfence }
   0xf   :  { %17 = vsyncpa [#allocation5], 0  ;;  %v23_v0 = vld [vmem:[%s1674_s2] sm:$0xff]  ;;  %v24_v1 = vld [vmem:[%s1674_s2 + $0x8] sm:$0xff]  ;;  %v1380_v3 = vmov 0.0|0.0   ;;  %vm1381_vm0 = vmmov 0  }
  0x10   :  { %v25_v2 = vld [vmem:[%s1674_s2 + $0x10] sm:$0xff]  ;;  %1195 = vmatprep.subr.bf16.mxu0 %v1380_v3  ;;  %v1432_v4 = vpack.c.bf16 %v24_v1, %v23_v0  ;;  %v26_v5 = vld [vmem:[%s1674_s2 + $0x18] sm:$0xff]  ;;  %v1382_v6 = vmov 0.0   ;;  %1201 = vmatprep.subr.bf16.mxu1 %v1380_v3 }
  0x11   :  { %1115 = vmatprep.mubr.msk.f32.mxu0 %vm1381_vm0, %v1382_v6  ;;  %1126 = vmatprep.mubr.msk.f32.mxu1 %vm1381_vm0, %v1382_v6 }
  0x12   :  { %18 = vsyncpa [#allocation7], 0  ;;  %1197 = vmatpush3.bf16.msra.mxu0 %v1432_v4  ;;  %v1443_v7 = vpack.c.bf16 %v26_v5, %v25_v2  ;;  %1203 = vmatpush3.bf16.msra.mxu1 %v1432_v4  ;;  %s1037_s2 = sld [smem:[#allocation3 + $0x1]]  ;;  %s27_s30 = sld [smem:[#allocation3]]  ;;  %vm36_vm1 = vcmask 1040384   ;;  %vm38_vm2 = vcmask 261120  }
  0x13   :  { %1198 = vmatprep.subr.bf16.mxu0 %v1380_v3  ;;  %1204 = vmatprep.subr.bf16.mxu1 %v1380_v3  ;;  %s1383_s12 = smov 32   ;;  %s1384_s13 = smov 64   ;;  %vm148_vm3 = vcmask 254976   ;;  %vm270_vm4 = vcmask 517376   ;;  %vm381_vm5 = vcmask 779776  }
  0x14   :  { %s1040_s14 = sld [smem:[#allocation3 + $0x3]]  ;;  %s1039_s15 = sld [smem:[#allocation3 + $0x2]] }
  0x15   :  { %s1044_s22 = sld [smem:[#allocation3 + $0x5]]  ;;  %s1043_s23 = sld [smem:[#allocation3 + $0x4]] }
  0x16   :  { %1200 = vmatpush3.bf16.msra.mxu0 %v1443_v7  ;;  %1206 = vmatpush3.bf16.msra.mxu1 %v1443_v7  ;;  %s1048_s29 = sld [smem:[#allocation3 + $0x7]] }
  0x17   :  { %1207 = vmatprep.subr.bf16.mxu0 %v1380_v3  ;;  %1213 = vmatprep.subr.bf16.mxu1 %v1380_v3 }
  0x18   :  { %s31_s8 = scalar_lea.vmem %s1673_s1, %s1037_s2  ;;  %s28_s11 = scalar_lea.vmem %s1673_s1, %s27_s30 }
  0x19   :  { %1116 = vmatmul.mubr.f32.vlgmr.msra.gmra.mrb[0].mxu0 %v1382_v6  ;;  %v32_v8 = vld [vmem:[%s31_s8] sm:$0x1]  ;;  %s1047_s2 = sld [smem:[#allocation3 + $0x6]] }
  0x1a   :  { %1209 = vmatpush3.bf16.msra.mxu0 %v1432_v4  ;;  %1137 = vmatprep.mubr.msk.f32.mxu0 %vm1381_vm0, %v1382_v6  ;;  %v34_v9 = vrot.slane %v32_v8, 7  ;;  %v29_v10 = vld [vmem:[%s28_s11] sm:$0x1]  ;;  %s154_s18 = scalar_lea.vmem %s1673_s1, %s1040_s14  ;;  %s151_s21 = scalar_lea.vmem %s1673_s1, %s1039_s15 }
  0x1b   :  { %1210 = vmatprep.subr.bf16.mxu0 %v1380_v3  ;;  %v155_v29 = vld [vmem:[%s154_s18] sm:$0x1]  ;;  %s276_s0 = scalar_lea.vmem %s1673_s1, %s1044_s22  ;;  %s273_s28 = scalar_lea.vmem %s1673_s1, %s1043_s23 }
  0x1c   :  { %v37_v11 = vsel %vm36_vm1, %v29_v10, %v34_v9  ;;  %v157_v30 = vrot.slane %v155_v29, 7  ;;  %v152_v31 = vld [vmem:[%s151_s21] sm:$0x1]  ;;  %s387_s7 = scalar_lea.vmem %s1673_s1, %s1048_s29  ;;  %s1052_s11 = sld [smem:[#allocation3 + $0x9]] }
  0x1d   :  { %v277_v50 = vld [vmem:[%s276_s0] sm:$0x1]  ;;  %s1051_s14 = sld [smem:[#allocation3 + $0x8]]  ;;  %s1056_s21 = sld [smem:[#allocation3 + $0xb]] }
  0x1e   :  { %1212 = vmatpush3.bf16.msra.mxu0 %v1443_v7  ;;  %v159_v32 = vsel %vm36_vm1, %v152_v31, %v157_v30  ;;  %v279_v51 = vrot.slane %v277_v50, 7  ;;  %v274_v52 = vld [vmem:[%s273_s28] sm:$0x1]  ;;  %s1055_s22 = sld [smem:[#allocation3 + $0xa]]  ;;  %s1060_s28 = sld [smem:[#allocation3 + $0xd]] }
  0x1f   :  { %1219 = vmatprep.subr.bf16.mxu0 %v1380_v3  ;;  %s384_s10 = scalar_lea.vmem %s1673_s1, %s1047_s2  ;;  %s1059_s29 = sld [smem:[#allocation3 + $0xc]] }
  0x20   :  { %v281_v53 = vsel %vm36_vm1, %v274_v52, %v279_v51 }
  0x22   :  { %s510_s17 = scalar_lea.vmem %s1673_s1, %s1052_s11  ;;  %s1063_s11 = sld [smem:[#allocation3 + $0xe]] }
  0x23   :  { %s507_s20 = scalar_lea.vmem %s1673_s1, %s1051_s14  ;;  %s631_s25 = scalar_lea.vmem %s1673_s1, %s1056_s21 }
  0x24   :  { %s628_s27 = scalar_lea.vmem %s1673_s1, %s1055_s22  ;;  %s752_s6 = scalar_lea.vmem %s1673_s1, %s1060_s28 }
  0x25   :  { %s749_s9 = scalar_lea.vmem %s1673_s1, %s1059_s29 }
  0x28   :  { %s859_s19 = scalar_lea.vmem %s1673_s1, %s1063_s11 }
  0xec   :  { %v108_v12 = vpop.f32.mrb[0].mxu0 }
  0xed   :  { %v112_v13 = vadd.f32 %v108_v12, %v37_v11  ;;  %v1117_v14 = vpop.f32.mrb[1].mxu0  ;;  %v388_v11 = vld [vmem:[%s387_s7] sm:$0x1] }
  0xee   :  { %v390_v12 = vrot.slane %v388_v11, 7 }
  0xef   :  { %1253 = vtanh.f32 %v112_v13  ;;  %v1038_v16 = vmul.f32 -1.442695, %v112_v13  ;;  %v385_v13 = vld [vmem:[%s384_s10] sm:$0x1]  ;;  %s1064_s10 = sld [smem:[#allocation3 + $0xf]] }
  0xf0   :  { %v392_v14 = vsel %vm36_vm1, %v385_v13, %v390_v12  ;;  %v753_v13 = vld [vmem:[%s752_s6] sm:$0x1] }
  0xf1   :  { %1255 = vpow2.f32 %v1038_v16 }
  0xf5   :  { %s862_s16 = scalar_lea.vmem %s1673_s1, %s1064_s10  ;;  %s1386_s1 = smov 96  }
  0xf9   :  { %v1254_v15 = vpop.eup %1253 }
  0xfa   :  { %122 = vrot.lane.b32.xlu0 %v1254_v15, %s1383_s12 }
  0xfb   :  { %v1256_v17 = vpop.eup %1255 }
  0xfc   :  { %v116_v18 = vadd.f32 1.0, %v1256_v17 }
  0xfe   :  { %1257 = vrcp.f32 %v116_v18 }
 0x108   :  { %v1258_v19 = vpop.eup %1257 }
 0x109   :  { %v120_v22 = vmul.f32 0.0, %v1258_v19 }
 0x16c   :  { %v123_v20 = vpop.permute.xlu0 %122 }
 0x16d   :  { %v125_v21 = vmul.f32 %v1258_v19, %v123_v20 }
 0x16f   :  { %127 = vrot.lane.b32.xlu0 %v125_v21, %s1383_s12 }
 0x1e1   :  { %v128_v23 = vpop.permute.xlu0 %127 }
 0x1e2   :  { %v130_v24 = vadd.f32 %v128_v23, %v120_v22 }
 0x1e4   :  { %1259 = vtanh.f32 %v130_v24 }
 0x1ee   :  { %v1260_v25 = vpop.eup %1259 }
 0x1ef   :  { %133 = vrot.lane.b32.xlu1 %v1260_v25, %s1383_s12 }
 0x261   :  { %v134_v26 = vpop.permute.xlu1 %133 }
 0x262   :  { %v1469_v27 = vmul.f32 %v1258_v19, %v134_v26 }
 0x264   :  { %160 = vrot.lane.b32.xlu1 %v1469_v27, %s1384_s13 }
 0x2d6   :  { %v161_v28 = vpop.permute.xlu1 %160 }
 0x2d7   :  { %1127 = vmatmul.mubr.msk.f32.vlgmr.msra.gmra.mrb[0].mxu1 %vm38_vm2, %v161_v28 }
 0x2d8   :  { %1215 = vmatpush3.bf16.msra.mxu1 %v1432_v4  ;;  %1148 = vmatprep.mubr.msk.f32.mxu1 %vm1381_vm0, %v1382_v6 }
 0x2d9   :  { %1216 = vmatprep.subr.bf16.mxu1 %v1380_v3 }
 0x2dc   :  { %1218 = vmatpush3.bf16.msra.mxu1 %v1443_v7 }
 0x2dd   :  { %1225 = vmatprep.subr.bf16.mxu1 %v1380_v3 }
 0x3aa   :  { %v230_v33 = vpop.f32.mrb[0].mxu1 }
 0x3ab   :  { %v234_v34 = vadd.f32 %v230_v33, %v159_v32  ;;  %v1128_v35 = vpop.f32.mrb[1].mxu1  ;;  %v511_v33 = vld [vmem:[%s510_s17] sm:$0x1] }
 0x3ac   :  { %v508_v35 = vld [vmem:[%s507_s20] sm:$0x1] }
 0x3ad   :  { %1261 = vtanh.f32 %v234_v34  ;;  %v1042_v37 = vmul.f32 -1.442695, %v234_v34  ;;  %v513_v34 = vrot.slane %v511_v33, 7 }
 0x3af   :  { %1263 = vpow2.f32 %v1042_v37 }
 0x3b7   :  { %v1262_v36 = vpop.eup %1261 }
 0x3b8   :  { %244 = vrot.lane.b32.xlu0 %v1262_v36, %s1383_s12  ;;  %v515_v36 = vsel %vm36_vm1, %v508_v35, %v513_v34 }
 0x3b9   :  { %v1264_v38 = vpop.eup %1263 }
 0x3ba   :  { %v238_v39 = vadd.f32 1.0, %v1264_v38 }
 0x3bc   :  { %1265 = vrcp.f32 %v238_v39 }
 0x3c6   :  { %v1266_v40 = vpop.eup %1265 }
 0x3c7   :  { %v242_v43 = vmul.f32 %v1266_v40, %v130_v24 }
 0x42a   :  { %v245_v41 = vpop.permute.xlu0 %244 }
 0x42b   :  { %v247_v42 = vmul.f32 %v1266_v40, %v245_v41 }
 0x42d   :  { %249 = vrot.lane.b32.xlu1 %v247_v42, %s1383_s12 }
 0x49f   :  { %v250_v44 = vpop.permute.xlu1 %249 }
 0x4a0   :  { %v252_v45 = vadd.f32 %v250_v44, %v242_v43 }
 0x4a2   :  { %1267 = vtanh.f32 %v252_v45 }
 0x4ac   :  { %v1268_v46 = vpop.eup %1267 }
 0x4ad   :  { %255 = vrot.lane.b32.xlu0 %v1268_v46, %s1383_s12 }
 0x51f   :  { %v256_v47 = vpop.permute.xlu0 %255 }
 0x520   :  { %v1490_v48 = vmul.f32 %v1266_v40, %v256_v47 }
 0x522   :  { %282 = vrot.lane.b32.xlu1 %v1490_v48, %s1384_s13 }
 0x594   :  { %v283_v49 = vpop.permute.xlu1 %282 }
 0x595   :  { %1138 = vmatmul.mubr.msk.f32.vlgmr.msra.gmra.mrb[2].mxu0 %vm38_vm2, %v283_v49 }
 0x596   :  { %1221 = vmatpush3.bf16.msra.mxu0 %v1432_v4  ;;  %1159 = vmatprep.mubr.msk.f32.mxu0 %vm1381_vm0, %v1382_v6 }
 0x597   :  { %1222 = vmatprep.subr.bf16.mxu0 %v1380_v3 }
 0x59a   :  { %1224 = vmatpush3.bf16.msra.mxu0 %v1443_v7 }
 0x59b   :  { %1231 = vmatprep.subr.bf16.mxu0 %v1380_v3 }
 0x668   :  { %v352_v54 = vpop.f32.mrb[2].mxu0 }
 0x669   :  { %v356_v55 = vadd.f32 %v352_v54, %v281_v53  ;;  %v1139_v56 = vpop.f32.mrb[3].mxu0 }
 0x66b   :  { %1269 = vtanh.f32 %v356_v55  ;;  %v1046_v58 = vmul.f32 -1.442695, %v356_v55  ;;  %v632_v55 = vld [vmem:[%s631_s25] sm:$0x1] }
 0x66c   :  { %v634_v56 = vrot.slane %v632_v55, 7 }
 0x66d   :  { %1271 = vpow2.f32 %v1046_v58 }
 0x675   :  { %v1270_v57 = vpop.eup %1269 }
 0x676   :  { %366 = vrot.lane.b32.xlu0 %v1270_v57, %s1383_s12 }
 0x677   :  { %v1272_v59 = vpop.eup %1271 }
 0x678   :  { %v360_v60 = vadd.f32 1.0, %v1272_v59 }
 0x67a   :  { %1273 = vrcp.f32 %v360_v60 }
 0x684   :  { %v1274_v61 = vpop.eup %1273 }
 0x685   :  { %v364_v0 = vmul.f32 %v1274_v61, %v252_v45 }
 0x6e8   :  { %v367_v62 = vpop.permute.xlu0 %366 }
 0x6e9   :  { %v369_v63 = vmul.f32 %v1274_v61, %v367_v62 }
 0x6eb   :  { %371 = vrot.lane.b32.xlu1 %v369_v63, %s1383_s12 }
 0x75d   :  { %v372_v1 = vpop.permute.xlu1 %371 }
 0x75e   :  { %v374_v2 = vadd.f32 %v372_v1, %v364_v0 }
 0x760   :  { %1275 = vtanh.f32 %v374_v2 }
 0x76a   :  { %v1276_v5 = vpop.eup %1275 }
 0x76b   :  { %377 = vrot.lane.b32.xlu0 %v1276_v5, %s1383_s12 }
 0x7dd   :  { %v378_v8 = vpop.permute.xlu0 %377 }
 0x7de   :  { %v1511_v9 = vmul.f32 %v1274_v61, %v378_v8 }
 0x7e0   :  { %394 = vrot.lane.b32.xlu1 %v1511_v9, %s1384_s13 }
 0x852   :  { %v395_v10 = vpop.permute.xlu1 %394 }
 0x853   :  { %1149 = vmatmul.mubr.msk.f32.vlgmr.msra.gmra.mrb[2].mxu1 %vm38_vm2, %v395_v10 }
 0x854   :  { %1227 = vmatpush3.bf16.msra.mxu1 %v1432_v4  ;;  %1170 = vmatprep.mubr.msk.f32.mxu1 %vm1381_vm0, %v1382_v6 }
 0x855   :  { %1228 = vmatprep.subr.bf16.mxu1 %v1380_v3 }
 0x858   :  { %1230 = vmatpush3.bf16.msra.mxu1 %v1443_v7 }
 0x859   :  { %1237 = vmatprep.subr.bf16.mxu1 %v1380_v3 }
 0x926   :  { %v464_v15 = vpop.f32.mrb[2].mxu1 }
 0x927   :  { %v468_v16 = vadd.f32 %v464_v15, %v392_v14  ;;  %v1150_v17 = vpop.f32.mrb[3].mxu1  ;;  %v755_v14 = vrot.slane %v753_v13, 7  ;;  %v750_v15 = vld [vmem:[%s749_s9] sm:$0x1] }
 0x929   :  { %1277 = vtanh.f32 %v468_v16  ;;  %v1050_v19 = vmul.f32 -1.442695, %v468_v16  ;;  %v757_v16 = vsel %vm36_vm1, %v750_v15, %v755_v14 }
 0x92b   :  { %1279 = vpow2.f32 %v1050_v19 }
 0x933   :  { %v1278_v18 = vpop.eup %1277 }
 0x934   :  { %478 = vrot.lane.b32.xlu0 %v1278_v18, %s1383_s12 }
 0x935   :  { %v1280_v20 = vpop.eup %1279 }
 0x936   :  { %v472_v21 = vadd.f32 1.0, %v1280_v20 }
 0x938   :  { %1281 = vrcp.f32 %v472_v21 }
 0x942   :  { %v1282_v22 = vpop.eup %1281 }
 0x943   :  { %v476_v25 = vmul.f32 %v1282_v22, %v374_v2 }
 0x9a6   :  { %v479_v23 = vpop.permute.xlu0 %478 }
 0x9a7   :  { %v481_v24 = vmul.f32 %v1282_v22, %v479_v23 }
 0x9a9   :  { %483 = vrot.lane.b32.xlu1 %v481_v24, %s1383_s12 }
 0xa1b   :  { %v484_v26 = vpop.permute.xlu1 %483 }
 0xa1c   :  { %v486_v28 = vadd.f32 %v484_v26, %v476_v25 }
 0xa1e   :  { %1283 = vtanh.f32 %v486_v28 }
 0xa28   :  { %v1284_v29 = vpop.eup %1283 }
 0xa29   :  { %489 = vrot.lane.b32.xlu0 %v1284_v29, %s1383_s12 }
 0xa9b   :  { %v490_v30 = vpop.permute.xlu0 %489 }
 0xa9c   :  { %v1532_v31 = vmul.f32 %v1282_v22, %v490_v30 }
 0xa9e   :  { %516 = vrot.lane.b32.xlu1 %v1532_v31, %s1384_s13 }
 0xb10   :  { %v517_v32 = vpop.permute.xlu1 %516 }
 0xb11   :  { %1160 = vmatmul.mubr.msk.f32.vlgmr.msra.gmra.mrb[4].mxu0 %vm38_vm2, %v517_v32 }
 0xb12   :  { %1233 = vmatpush3.bf16.msra.mxu0 %v1432_v4  ;;  %1181 = vmatprep.mubr.msk.f32.mxu0 %vm1381_vm0, %v1382_v6 }
 0xb13   :  { %1234 = vmatprep.subr.bf16.mxu0 %v1380_v3 }
 0xb16   :  { %1236 = vmatpush3.bf16.msra.mxu0 %v1443_v7 }
 0xbe4   :  { %v586_v37 = vpop.f32.mrb[4].mxu0 }
 0xbe5   :  { %v590_v38 = vadd.f32 %v586_v37, %v515_v36  ;;  %v1161_v39 = vpop.f32.mrb[5].mxu0  ;;  %v863_v36 = vld [vmem:[%s862_s16] sm:$0x1] }
 0xbe6   :  { %v865_v37 = vrot.slane %v863_v36, 7 }
 0xbe7   :  { %1285 = vtanh.f32 %v590_v38  ;;  %v1054_v41 = vmul.f32 -1.442695, %v590_v38  ;;  %v860_v38 = vld [vmem:[%s859_s19] sm:$0x1] }
 0xbe8   :  { %v867_v39 = vsel %vm36_vm1, %v860_v38, %v865_v37 }
 0xbe9   :  { %1287 = vpow2.f32 %v1054_v41 }
 0xbf1   :  { %v1286_v40 = vpop.eup %1285 }
 0xbf2   :  { %600 = vrot.lane.b32.xlu0 %v1286_v40, %s1383_s12 }
 0xbf3   :  { %v1288_v42 = vpop.eup %1287 }
 0xbf4   :  { %v594_v43 = vadd.f32 1.0, %v1288_v42 }
 0xbf6   :  { %1289 = vrcp.f32 %v594_v43 }
 0xc00   :  { %v1290_v44 = vpop.eup %1289 }
 0xc01   :  { %v598_v47 = vmul.f32 %v1290_v44, %v486_v28 }
 0xc64   :  { %v601_v45 = vpop.permute.xlu0 %600 }
 0xc65   :  { %v603_v46 = vmul.f32 %v1290_v44, %v601_v45 }
 0xc67   :  { %605 = vrot.lane.b32.xlu1 %v603_v46, %s1383_s12 }
 0xcd9   :  { %v606_v49 = vpop.permute.xlu1 %605 }
 0xcda   :  { %v608_v50 = vadd.f32 %v606_v49, %v598_v47  ;;  %v1385_v47 = vmov 1983009808  }
 0xcdb   :  { %v139_v49 = vunpack.c.l.s4 %v1385_v47 }
 0xcdc   :  { %1291 = vtanh.f32 %v608_v50 }
 0xce6   :  { %v1292_v51 = vpop.eup %1291 }
 0xce7   :  { %611 = vrot.lane.b32.xlu0 %v1292_v51, %s1383_s12  ;;  %v140_v51 = vunpack.c.0.s8 %v139_v49 }
 0xd59   :  { %v612_v52 = vpop.permute.xlu0 %611 }
 0xd5a   :  { %v1552_v53 = vmul.f32 %v1290_v44, %v612_v52 }
 0xd5c   :  { %637 = vrot.lane.b32.xlu1 %v1552_v53, %s1384_s13 }
 0xdce   :  { %v638_v54 = vpop.permute.xlu1 %637 }
 0xdcf   :  { %1171 = vmatmul.mubr.msk.f32.vlgmr.msra.gmra.mrb[4].mxu1 %vm38_vm2, %v638_v54 }
 0xdd0   :  { %1239 = vmatpush3.bf16.msra.mxu1 %v1432_v4  ;;  %1192 = vmatprep.mubr.msk.f32.mxu1 %vm1381_vm0, %v1382_v6  ;;  %v629_v4 = vld [vmem:[%s628_s27] sm:$0x1]  ;;  %s1387_s27 = smov [#allocation6]  }
 0xdd1   :  { %1240 = vmatprep.subr.bf16.mxu1 %v1380_v3  ;;  %v636_v57 = vsel %vm36_vm1, %v629_v4, %v634_v56  ;;  %s1007_s28 = sshll.u32 %s1387_s27, 4  ;;  %s1008_s28 = int_to_ptr.vmem [resolvable:$true] %s1007_s28 }
 0xdd2   :  { %s1329_s6 = scalar_lea.vmem %s1008_s28, 32  ;;  %p1334_p6 = scmp.lt.s32.totalorder %s1008_s28, %s1008_s28 }
 0xdd3   :  { %p1330_p5 = scmp.ne.s32.totalorder %s1008_s28, %s1329_s6  ;;  %p1335_p7 = scmp.lt.s32.totalorder %s1329_s6, %s1329_s6 }
 0xdd4   :  { %1242 = vmatpush3.bf16.msra.mxu1 %v1443_v7 }
 0xdd5   :  { %p1336_p8 = por %p1335_p7, %p1334_p6 }
 0xdd7   :  { %p1337_p9 = pnand %p1336_p8, %p1330_p5 }
 0xea2   :  { %v707_v6 = vpop.f32.mrb[4].mxu1 }
 0xea3   :  { %v711_v58 = vadd.f32 %v707_v6, %v636_v57  ;;  %v1172_v3 = vpop.f32.mrb[5].mxu1 }
 0xea5   :  { %1293 = vtanh.f32 %v711_v58  ;;  %v1058_v59 = vmul.f32 -1.442695, %v711_v58 }
 0xea7   :  { %1295 = vpow2.f32 %v1058_v59 }
 0xeaf   :  { %v1294_v7 = vpop.eup %1293 }
 0xeb0   :  { %721 = vrot.lane.b32.xlu0 %v1294_v7, %s1383_s12 }
 0xeb1   :  { %v1296_v60 = vpop.eup %1295 }
 0xeb2   :  { %v715_v61 = vadd.f32 1.0, %v1296_v60 }
 0xeb4   :  { %1297 = vrcp.f32 %v715_v61 }
 0xebe   :  { %v1298_v62 = vpop.eup %1297 }
 0xebf   :  { %v719_v1 = vmul.f32 %v1298_v62, %v608_v50  ;;  %v141_v50 = vlaneseq }
 0xec1   :  { %v142_v52 = vshrl.u32 %v141_v50, 7 }
 0xec3   :  { %v143_v56 = vsub.s32 %v140_v51, %v142_v52 }
 0xec5   :  { %v144_v57 = vrot.slane %v1469_v27, %v143_v56  ;;  %v266_v6 = vrot.slane %v1490_v48, %v143_v56  ;;  %v622_v60 = vrot.slane %v1552_v53, %v143_v56 }
 0xf22   :  { %v722_v63 = vpop.permute.xlu0 %721 }
 0xf23   :  { %v724_v0 = vmul.f32 %v1298_v62, %v722_v63 }
 0xf25   :  { %726 = vrot.lane.b32.xlu1 %v724_v0, %s1383_s12 }
 0xf97   :  { %v727_v2 = vpop.permute.xlu1 %726 }
 0xf98   :  { %v729_v5 = vadd.f32 %v727_v2, %v719_v1  ;;  %v500_v2 = vrot.slane %v1532_v31, %v143_v56 }
 0xf9a   :  { %1299 = vtanh.f32 %v729_v5 }
 0xfa4   :  { %v1300_v8 = vpop.eup %1299 }
 0xfa5   :  { %732 = vrot.lane.b32.xlu0 %v1300_v8, %s1383_s12 }
0x1017   :  { %v733_v10 = vpop.permute.xlu0 %732 }
0x1018   :  { %v1572_v11 = vmul.f32 %v1298_v62, %v733_v10 }
0x101a   :  { %758 = vrot.lane.b32.xlu1 %v1572_v11, %s1384_s13  ;;  %v743_v61 = vrot.slane %v1572_v11, %v143_v56 }
0x108c   :  { %v759_v12 = vpop.permute.xlu1 %758 }
0x108d   :  { %1182 = vmatmul.mubr.msk.f32.vlgmr.msra.gmra.mrb[6].mxu0 %vm38_vm2, %v759_v12 }
0x1160   :  { %v828_v17 = vpop.f32.mrb[6].mxu0 }
0x1161   :  { %v832_v18 = vadd.f32 %v828_v17, %v757_v16  ;;  %v1183_v19 = vpop.f32.mrb[7].mxu0 }
0x1163   :  { %1301 = vtanh.f32 %v832_v18  ;;  %v1062_v21 = vmul.f32 -1.442695, %v832_v18 }
0x1165   :  { %1303 = vpow2.f32 %v1062_v21 }
0x116d   :  { %v1302_v20 = vpop.eup %1301 }
0x116e   :  { %842 = vrot.lane.b32.xlu0 %v1302_v20, %s1383_s12 }
0x116f   :  { %v1304_v22 = vpop.eup %1303 }
0x1170   :  { %v836_v23 = vadd.f32 1.0, %v1304_v22 }
0x1172   :  { %1305 = vrcp.f32 %v836_v23 }
0x117c   :  { %v1306_v24 = vpop.eup %1305 }
0x117d   :  { %v840_v28 = vmul.f32 %v1306_v24, %v729_v5 }
0x11e0   :  { %v843_v25 = vpop.permute.xlu0 %842 }
0x11e1   :  { %v845_v26 = vmul.f32 %v1306_v24, %v843_v25 }
0x11e3   :  { %847 = vrot.lane.b32.xlu1 %v845_v26, %s1383_s12 }
0x1255   :  { %v848_v29 = vpop.permute.xlu1 %847 }
0x1256   :  { %v850_v30 = vadd.f32 %v848_v29, %v840_v28 }
0x1258   :  { %1307 = vtanh.f32 %v850_v30 }
0x1262   :  { %v1308_v32 = vpop.eup %1307 }
0x1263   :  { %853 = vrot.lane.b32.xlu0 %v1308_v32, %s1383_s12 }
0x12d5   :  { %v854_v33 = vpop.permute.xlu0 %853 }
0x12d6   :  { %v1587_v34 = vmul.f32 %v1306_v24, %v854_v33 }
0x12d8   :  { %869 = vrot.lane.b32.xlu1 %v1587_v34, %s1384_s13 }
0x134a   :  { %v870_v35 = vpop.permute.xlu1 %869 }
0x134b   :  { %1193 = vmatmul.mubr.msk.f32.vlgmr.msra.gmra.mrb[6].mxu1 %vm38_vm2, %v870_v35 }
0x141e   :  { %v939_v40 = vpop.f32.mrb[6].mxu1 }
0x141f   :  { %v943_v41 = vadd.f32 %v939_v40, %v867_v39  ;;  %v1194_v42 = vpop.f32.mrb[7].mxu1 }
0x1421   :  { %1309 = vtanh.f32 %v943_v41  ;;  %v1066_v44 = vmul.f32 -1.442695, %v943_v41 }
0x1423   :  { %1311 = vpow2.f32 %v1066_v44 }
0x142b   :  { %v1310_v43 = vpop.eup %1309 }
0x142c   :  { %953 = vrot.lane.b32.xlu0 %v1310_v43, %s1383_s12 }
0x142d   :  { %v1312_v45 = vpop.eup %1311 }
0x142e   :  { %v947_v46 = vadd.f32 1.0, %v1312_v45 }
0x1430   :  { %1313 = vrcp.f32 %v947_v46 }
0x143a   :  { %v1314_v54 = vpop.eup %1313 }
0x143b   :  { %v951_v58 = vmul.f32 %v1314_v54, %v850_v30 }
0x149e   :  { %v954_v55 = vpop.permute.xlu0 %953 }
0x149f   :  { %v956_v4 = vmul.f32 %v1314_v54, %v954_v55 }
0x14a1   :  { %958 = vrot.lane.b32.xlu1 %v956_v4, %s1383_s12 }
0x14a5   :  { %145 = vrot.lane.b32.xlu1 %v144_v57, %s1384_s13 }
0x14a9   :  { %267 = vrot.lane.b32.xlu1 %v266_v6, %s1386_s1 }
0x1513   :  { %v959_v3 = vpop.permute.xlu1 %958 }
0x1514   :  { %v961_v7 = vadd.f32 %v959_v3, %v951_v58 }
0x1516   :  { %1315 = vtanh.f32 %v961_v7 }
0x1517   :  { %v146_v59 = vpop.permute.xlu1 %145 }
0x1518   :  { %149 = vst.msk [vmem:[%s1675_s3] sm:$0x3] %vm148_vm3, %v146_v59 }
0x151b   :  { %v268_v27 = vpop.permute.xlu1 %267 }
0x151c   :  { %271 = vst.msk [vmem:[%s1675_s3] sm:$0x3] %vm270_vm4, %v268_v27 }
0x151d   :  { %382 = vst.msk [vmem:[%s1675_s3] sm:$0x3] %vm381_vm5, %v1511_v9 }
0x1520   :  { %v1316_v48 = vpop.eup %1315 }
0x1521   :  { %964 = vrot.lane.b32.xlu0 %v1316_v48, %s1383_s12 }
0x1525   :  { %623 = vrot.lane.b32.xlu0 %v622_v60, %s1384_s13 }
0x1529   :  { %744 = vrot.lane.b32.xlu0 %v743_v61, %s1386_s1 }
0x152d   :  { %985 = vrot.lane.b32.xlu0 %v961_v7, %s1386_s1 }
0x1593   :  { %v965_v62 = vpop.permute.xlu0 %964 }
0x1594   :  { %v967_v63 = vmul.f32 %v1314_v54, %v965_v62 }
0x1596   :  { %v975_v0 = vrot.slane %v967_v63, %v143_v56  ;;  %980 = vrot.lane.b32.xlu1 %v967_v63, %s1384_s13 }
0x1597   :  { %v624_v1 = vpop.permute.xlu0 %623 }
0x1598   :  { %626 = vst.msk [vmem:[%s1675_s3 + $0x2] sm:$0x3] %vm148_vm3, %v624_v1  ;;  %976 = vrot.lane.b32.xlu0 %v975_v0, %s1383_s12 }
0x159a   :  { %501 = vrot.lane.b32.xlu1 %v500_v2, %s1383_s12 }
0x159b   :  { %v745_v9 = vpop.permute.xlu0 %744 }
0x159c   :  { %747 = vst.msk [vmem:[%s1675_s3 + $0x2] sm:$0x3] %vm270_vm4, %v745_v9 }
0x159d   :  { %857 = vst.msk [vmem:[%s1675_s3 + $0x2] sm:$0x3] %vm381_vm5, %v1587_v34 }
0x159f   :  { %v986_v31 = vpop.permute.xlu0 %985 }
0x15a0   :  { %988 = vst.msk [vmem:[#allocation6] sm:$0x3] %vm148_vm3, %v986_v31 }
0x15a1   :  { %1340 = shalt.err (!%p1337_p9)
}
0x15a2   :  { %s1341_s8 = scalar_lea.hbm %s1677_s5, 32 }
0x15a3   :  { %p1342_p10 = scmp.ne.s32.totalorder %s1677_s5, %s1341_s8  ;;  %p1345_p11 = scmp.lt.u32.totalorder %s1341_s8, %s1677_s5 }
0x15a5   :  { %p1347_p12 = pnand %p1345_p11, %p1342_p10 }
0x15a7   :  { %1350 = shalt.err (!%p1347_p12)
}
0x15a8   :  { %1010 = dma.vmem_to_hbm [thread:$0]  %s1008_s28, 32, %s1677_s5, [#allocation7]   ;;  %vm504_vm6 = vcmask 1042176  }
0x15a9   :  { %s1388_s17 = smov [#allocation4]  }
0x15aa   :  { %s997_s18 = sshll.u32 %s1388_s17, 4  ;;  %s998_s18 = int_to_ptr.vmem [resolvable:$true] %s997_s18 }
0x15ab   :  { %s1351_s19 = scalar_lea.vmem %s998_s18, 32  ;;  %p1356_p0 = scmp.lt.s32.totalorder %s998_s18, %s998_s18 }
0x15ac   :  { %p1352_p13 = scmp.ne.s32.totalorder %s998_s18, %s1351_s19  ;;  %p1357_p1 = scmp.lt.s32.totalorder %s1351_s19, %s1351_s19 }
0x15ae   :  { %p1358_p2 = por %p1357_p1, %p1356_p0 }
0x15b0   :  { %p1359_p3 = pnand %p1358_p2, %p1352_p13 }
0x1608   :  { %v981_v53 = vpop.permute.xlu1 %980 }
0x1609   :  { %983 = vst.msk [vmem:[#allocation4] sm:$0x3] %vm148_vm3, %v981_v53 }
0x160a   :  { %v977_v5 = vpop.permute.xlu0 %976 }
0x160b   :  { %1362 = shalt.err (!%p1359_p3)
}
0x160c   :  { %s1363_s21 = scalar_lea.hbm %s1676_s4, 32 }
0x160d   :  { %p1364_p4 = scmp.ne.s32.totalorder %s1676_s4, %s1363_s21  ;;  %p1367_p5 = scmp.lt.u32.totalorder %s1363_s21, %s1676_s4 }
0x160f   :  { %p1369_p6 = pnand %p1367_p5, %p1364_p4 }
0x1611   :  { %1372 = shalt.err (!%p1369_p6)
}
0x1612   :  { %1000 = dma.vmem_to_hbm [thread:$0]  %s998_s18, 32, %s1676_s4, [#allocation5]   ;;  %979 = vst.msk [vmem:[%s1675_s3 + $0x2] sm:$0x3] %vm504_vm6, %v977_v5  ;;  %v502_v8 = vpop.permute.xlu1 %501 }
0x1613   :  { %505 = vst.msk [vmem:[%s1675_s3] sm:$0x3] %vm504_vm6, %v502_v8 }
0x1614   :  { %1375 = dma.done.wait [#allocation5], 32  }
0x1615   :  { %1376 = vsyncadd [#allocation5], 4294967264 }
0x1616   :  { %1377 = dma.done.wait [#allocation7], 32  }
0x1617   :  { %1378 = vsyncadd [#allocation7], 4294967264 }
0x1618   :  { %1019 = vsyncpa [#allocation5], 1 }
0x1619   :  { %1020 = vsyncpa [#allocation7], 1 }

</bundles_post_ra>
